<compile_context>
chip_gen: v7x
topology: tpu7x:2x2x1
jax: 0.10.0
libtpu: 0.0.40
codegen_flags: <defaults>
</compile_context>

<pallas_src>
import functools

import jax
import jax.numpy as jnp
from jax.experimental import pallas as pl
from jax.experimental.pallas import tpu as pltpu

B, T, D, H = 2, 8, 128, 128
OUT_DIM = 1  # loss_type == 'mocorank' -> output_dim = 1


# ----------------------------- Pallas kernel ------------------------------ #
def fused_qk_kernel(x_ref, w1_ref, w2_ref, misc_ref, out_ref, *,
                    batch, seq, hidden, mxu_dtype):
    """Single-invocation fused forward for both backbones (q and k).

    x_ref:    (B*T, D)     shared input rows (row index = b*T + t)
    w1_ref:   (D, 2H)      [w1_q | w1_k]
    w2_ref:   (H, 2H)      [w2_q | w2_k]
    misc_ref: (8, 2H)      row 0 = [b1_q|b1_k], row 1 = [b2_q|b2_k],
                           row 2 = [b3_q bcast | b3_k bcast], row 3 = [w3_q|w3_k],
                           rows 4..7 zero padding (full sublane tile, one DMA).
    out_ref:  (2, ROWS, H) per model m: rows 0..B-1 = feat, rows B..2B-1 = pred
                           broadcast across lanes, remaining rows padding.
    """
    h2 = 2 * hidden
    x = x_ref[...]
    w1 = w1_ref[...]
    w2 = w2_ref[...]
    misc = misc_ref[...]
    b1 = misc[0:1, :]
    b2 = misc[1:2, :]
    b3 = misc[2:3, :]
    w3 = misc[3:4, :]

    # ---- layer 1 for BOTH models in one MXU push: (B*T, D) @ (D, 2H) ----
    h = jnp.dot(x.astype(mxu_dtype), w1.astype(mxu_dtype),
                preferred_element_type=jnp.float32) + b1
    h = jnp.maximum(h, 0.0)                                  # relu (VPU, f32)

    # ---- temporal mean pooling + repack to (2B, H) rows ----
    # rows 0..B-1 -> model q pooled, rows B..2B-1 -> model k pooled.
    # Static slices + sublane reduction (XLU); T == 8 keeps slices tile-aligned.
    rows = []
    for m in range(2):
        c0 = m * hidden
        for bi in range(batch):
            seg = h[bi * seq:(bi + 1) * seq, c0:c0 + hidden]   # (T, H)
            rows.append(jnp.mean(seg, axis=0, keepdims=True))  # (1, H)
    lhs = jnp.concatenate(rows, axis=0)                        # (2B, H)

    # ---- layer 2 for BOTH models in one MXU push: (2B, H) @ (H, 2H) ----
    # Only the [0:B, 0:H] (q) and [B:2B, H:2H] (k) quadrants are used;
    # the cross-term quadrants are free FLOPs on an otherwise drain-bound MXU.
    z = jnp.dot(lhs.astype(mxu_dtype), w2.astype(mxu_dtype),
                preferred_element_type=jnp.float32) + b2
    feat_full = jnp.tanh(z)                                    # (2B, 2H) (EUP)
    feat_q = feat_full[0:batch, 0:hidden]                      # (B, H)
    feat_k = feat_full[batch:2 * batch, hidden:h2]             # (B, H)

    # ---- final H -> 1 projection: VPU multiply + lane reduction (no MXU) ----
    pred_q = jnp.sum(feat_q * w3[:, 0:hidden], axis=-1, keepdims=True) \
        + b3[:, 0:1]                                           # (B, 1)
    pred_k = jnp.sum(feat_k * w3[:, hidden:h2], axis=-1, keepdims=True) \
        + b3[:, hidden:hidden + 1]                             # (B, 1)

    # ---- one lane-dense (ROWS, H) slab per model: full unmasked tile stores --
    rows_out = out_ref.shape[1]
    pieces_q = [feat_q, jnp.broadcast_to(pred_q, (batch, hidden))]
    pieces_k = [feat_k, jnp.broadcast_to(pred_k, (batch, hidden))]
    if rows_out > 2 * batch:
        pad = jnp.zeros((rows_out - 2 * batch, hidden), jnp.float32)
        pieces_q.append(pad)
        pieces_k.append(pad)
    out_ref[0] = jnp.concatenate(pieces_q, axis=0)
    out_ref[1] = jnp.concatenate(pieces_k, axis=0)


# --------------------------- parameter packing ----------------------------- #
def pack_params(params_q, params_k):
    """Pre-pack both backbones' parameters ONCE (outside the forward path)."""
    ps = [params_q, params_k]
    w1 = jnp.concatenate([p["w1"] for p in ps], axis=1)            # (D, 2H)
    w2 = jnp.concatenate([p["w2"] for p in ps], axis=1)            # (H, 2H)
    b1 = jnp.concatenate([p["b1"] for p in ps])                    # (2H,)
    b2 = jnp.concatenate([p["b2"] for p in ps])                    # (2H,)
    b3 = jnp.concatenate(
        [jnp.full((H,), p["b3"], jnp.float32) for p in ps])        # (2H,)
    w3 = jnp.concatenate([p["w3"] for p in ps])                    # (2H,)
    misc = jnp.zeros((8, 2 * H), jnp.float32)                      # full (8,256) tile
    misc = misc.at[0].set(b1).at[1].set(b2).at[2].set(b3).at[3].set(w3)
    return {"w1": w1, "w2": w2, "misc": misc}


# ------------------------------ fused wrapper ------------------------------ #
@functools.partial(jax.jit, static_argnames=("mxu_dtype",))
def fused_qk_forward(x, packed, mxu_dtype=jnp.float32):
    """Run both backbones (shared input x) in ONE gridless pallas_call."""
    b, t, d = x.shape
    # TODO(synk): T must stay a multiple of 8 (f32 sublane tile) for the pooling
    # slices to stay tile-aligned; otherwise fold 1/T into the layer-2 LHS.
    x2d = x.reshape(b * t, d)                                   # lane-dense rows
    rows_out = max(8, ((2 * b + 7) // 8) * 8)                   # sublane-aligned slab

    kernel = functools.partial(fused_qk_kernel, batch=b, seq=t, hidden=H,
                               mxu_dtype=mxu_dtype)
    flops = 2 * (b * t) * d * (2 * H) + 2 * (2 * b) * H * (2 * H)
    bytes_accessed = 4 * (x2d.size + packed["w1"].size + packed["w2"].size
                          + packed["misc"].size + 2 * rows_out * H)

    out = pl.pallas_call(
        kernel,
        out_shape=jax.ShapeDtypeStruct((2, rows_out, H), jnp.float32),
        in_specs=[pl.BlockSpec(memory_space=pltpu.MemorySpace.VMEM)] * 4,
        out_specs=pl.BlockSpec(memory_space=pltpu.MemorySpace.VMEM),
        cost_estimate=pl.CostEstimate(
            flops=flops,
            transcendentals=2 * b * 2 * H,          # tanh on the (2B, 2H) slab
            bytes_accessed=bytes_accessed),
    )(x2d, packed["w1"], packed["w2"], packed["misc"])

    feat = out[:, :b, :]                    # (2, B, H)   rows 0..B-1
    pred = out[:, b:2 * b, 0:OUT_DIM]       # (2, B, 1)   rows B..2B-1, lane 0
    return pred, feat


# ---------------------- module-level forward semantics --------------------- #
def multi_engagement_predictor_forward(x, packed_qk, loss_type="mocorank"):
    """Mirrors MultiEngagementPredictor.forward:
    returns (pred_q, feat_q, pred_k, feat_k)."""
    pred, feat = fused_qk_forward(x, packed_qk)
    pred_q, feat_q = pred[0], feat[0]
    if loss_type == "mocorank":
        # torch.no_grad() on the key encoder -> stop_gradient
        pred_k = jax.lax.stop_gradient(pred[1])
        feat_k = jax.lax.stop_gradient(feat[1])
    else:
        # TODO(synk): non-mocorank path still runs the fused 2-model kernel with
        # duplicated q params; k outputs are discarded (module returns None).
        pred_k, feat_k = None, None
    return pred_q, feat_q, pred_k, feat_k


# ------------------------------ param setup -------------------------------- #
def init_backbone_params(key):
    k1, k2, k3 = jax.random.split(key, 3)
    return {
        "w1": jax.random.normal(k1, (D, H), jnp.float32) * 0.05,
        "b1": jnp.zeros((H,), jnp.float32),
        "w2": jax.random.normal(k2, (H, H), jnp.float32) * 0.05,
        "b2": jnp.zeros((H,), jnp.float32),
        # final projection stored as a length-H row (OUT_DIM = 1)
        "w3": jax.random.normal(k3, (H,), jnp.float32) * 0.05,
        "b3": jnp.zeros((), jnp.float32),
    }


# ------------------------------ pure-JAX ref ------------------------------- #
def backbone_ref(x, p):
    h = jnp.maximum(x @ p["w1"] + p["b1"], 0.0)        # (B, T, H)
    pooled = jnp.mean(h, axis=1)                        # (B, H)
    feat = jnp.tanh(pooled @ p["w2"] + p["b2"])         # (B, H)
    pred = feat @ p["w3"][:, None] + p["b3"]            # (B, OUT_DIM)
    return pred, feat


if __name__ == "__main__":
    key = jax.random.PRNGKey(0)
    kx, kp = jax.random.split(key)

    x = jax.random.normal(kx, (B, T, D), jnp.float32)

    params_q = init_backbone_params(kp)
    # mocorank: model_k params are copied from model_q at init
    params_k = jax.tree_util.tree_map(lambda a: a, params_q)

    # parameters are packed ONCE, outside the forward path
    packed_qk = pack_params(params_q, params_k)
    packed_qk = jax.tree_util.tree_map(jax.block_until_ready, packed_qk)

    pred_q, feat_q, pred_k, feat_k = multi_engagement_predictor_forward(
        x, packed_qk, loss_type="mocorank")
    jax.block_until_ready((pred_q, feat_q, pred_k, feat_k))

    # correctness check against pure-JAX reference (f32 MXU path, 1e-5 tol)
    rq, fq = backbone_ref(x, params_q)
    assert pred_q.shape == (B, OUT_DIM) and feat_q.shape == (B, H)
    assert jnp.allclose(pred_q, rq, atol=1e-5, rtol=1e-5)
    assert jnp.allclose(feat_q, fq, atol=1e-5, rtol=1e-5)
    assert jnp.allclose(pred_k, rq, atol=1e-5, rtol=1e-5)
    assert jnp.allclose(feat_k, fq, atol=1e-5, rtol=1e-5)

    print("KERNEL_OK")
</pallas_src>

<mosaic_0001>
module attributes {stable_mosaic.version = 11 : i64} {
  func.func @fused_qk_kernel(%arg0: memref<16x128xf32, #tpu.memory_space<vmem>>, %arg1: memref<128x256xf32, #tpu.memory_space<vmem>>, %arg2: memref<128x256xf32, #tpu.memory_space<vmem>>, %arg3: memref<8x256xf32, #tpu.memory_space<vmem>>, %arg4: memref<2x8x128xf32, #tpu.memory_space<vmem>>) attributes {dimension_semantics = [], scalar_prefetch = 0 : i64, scratch_operands = 0 : i64, tpu.core_type = #tpu.core_type<tc>} {
    %c0 = arith.constant 0 : index
    %c0_0 = arith.constant 0 : index
    %0 = vector.load %arg0[%c0, %c0_0] : memref<16x128xf32, #tpu.memory_space<vmem>>, vector<16x128xf32>
    %c0_1 = arith.constant 0 : index
    %c0_2 = arith.constant 0 : index
    %1 = vector.load %arg1[%c0_1, %c0_2] : memref<128x256xf32, #tpu.memory_space<vmem>>, vector<128x256xf32>
    %c0_3 = arith.constant 0 : index
    %c0_4 = arith.constant 0 : index
    %2 = vector.load %arg2[%c0_3, %c0_4] : memref<128x256xf32, #tpu.memory_space<vmem>>, vector<128x256xf32>
    %c0_5 = arith.constant 0 : index
    %c0_6 = arith.constant 0 : index
    %3 = vector.load %arg3[%c0_5, %c0_6] : memref<8x256xf32, #tpu.memory_space<vmem>>, vector<8x256xf32>
    %4 = vector.extract_strided_slice %3 {offsets = [0, 0], sizes = [1, 256], strides = [1, 1]} : vector<8x256xf32> to vector<1x256xf32>
    %5 = vector.extract_strided_slice %3 {offsets = [1, 0], sizes = [1, 256], strides = [1, 1]} : vector<8x256xf32> to vector<1x256xf32>
    %6 = vector.extract_strided_slice %3 {offsets = [2, 0], sizes = [1, 256], strides = [1, 1]} : vector<8x256xf32> to vector<1x256xf32>
    %7 = vector.extract_strided_slice %3 {offsets = [3, 0], sizes = [1, 256], strides = [1, 1]} : vector<8x256xf32> to vector<1x256xf32>
    %cst = arith.constant dense<0.000000e+00> : vector<16x256xf32>
    %8 = tpu.matmul %0, %1, %cst {dimension_numbers = #tpu.dot_dimension_numbers<[1], [0], [0], [1], [0, 0, 1, 1], [], []>} : vector<16x128xf32>, vector<128x256xf32>, vector<16x256xf32> -> vector<16x256xf32>
    %9 = vector.broadcast %4 : vector<1x256xf32> to vector<16x256xf32>
    %10 = arith.addf %8, %9 : vector<16x256xf32>
    %cst_7 = arith.constant 0.000000e+00 : f32
    %11 = vector.broadcast %cst_7 : f32 to vector<16x256xf32>
    %12 = arith.maximumf %10, %11 : vector<16x256xf32>
    %13 = vector.extract_strided_slice %12 {offsets = [0, 0], sizes = [8, 128], strides = [1, 1]} : vector<16x256xf32> to vector<8x128xf32>
    %cst_8 = arith.constant dense<0.000000e+00> : vector<128xf32>
    %14 = vector.multi_reduction <add>, %13, %cst_8 [0] : vector<8x128xf32> to vector<128xf32>
    %15 = vector.shape_cast %14 : vector<128xf32> to vector<1x128xf32>
    %cst_9 = arith.constant 8.000000e+00 : f32
    %16 = vector.broadcast %cst_9 : f32 to vector<1x128xf32>
    %17 = arith.divf %15, %16 : vector<1x128xf32>
    %18 = vector.extract_strided_slice %12 {offsets = [8, 0], sizes = [8, 128], strides = [1, 1]} : vector<16x256xf32> to vector<8x128xf32>
    %cst_10 = arith.constant dense<0.000000e+00> : vector<128xf32>
    %19 = vector.multi_reduction <add>, %18, %cst_10 [0] : vector<8x128xf32> to vector<128xf32>
    %20 = vector.shape_cast %19 : vector<128xf32> to vector<1x128xf32>
    %cst_11 = arith.constant 8.000000e+00 : f32
    %21 = vector.broadcast %cst_11 : f32 to vector<1x128xf32>
    %22 = arith.divf %20, %21 : vector<1x128xf32>
    %23 = vector.extract_strided_slice %12 {offsets = [0, 128], sizes = [8, 128], strides = [1, 1]} : vector<16x256xf32> to vector<8x128xf32>
    %cst_12 = arith.constant dense<0.000000e+00> : vector<128xf32>
    %24 = vector.multi_reduction <add>, %23, %cst_12 [0] : vector<8x128xf32> to vector<128xf32>
    %25 = vector.shape_cast %24 : vector<128xf32> to vector<1x128xf32>
    %cst_13 = arith.constant 8.000000e+00 : f32
    %26 = vector.broadcast %cst_13 : f32 to vector<1x128xf32>
    %27 = arith.divf %25, %26 : vector<1x128xf32>
    %28 = vector.extract_strided_slice %12 {offsets = [8, 128], sizes = [8, 128], strides = [1, 1]} : vector<16x256xf32> to vector<8x128xf32>
    %cst_14 = arith.constant dense<0.000000e+00> : vector<128xf32>
    %29 = vector.multi_reduction <add>, %28, %cst_14 [0] : vector<8x128xf32> to vector<128xf32>
    %30 = vector.shape_cast %29 : vector<128xf32> to vector<1x128xf32>
    %cst_15 = arith.constant 8.000000e+00 : f32
    %31 = vector.broadcast %cst_15 : f32 to vector<1x128xf32>
    %32 = arith.divf %30, %31 : vector<1x128xf32>
    %33 = tpu.concatenate %17, %22, %27, %32 in 0 : vector<1x128xf32>, vector<1x128xf32>, vector<1x128xf32>, vector<1x128xf32> -> vector<4x128xf32>
    %cst_16 = arith.constant dense<0.000000e+00> : vector<4x256xf32>
    %34 = tpu.matmul %33, %2, %cst_16 {dimension_numbers = #tpu.dot_dimension_numbers<[1], [0], [0], [1], [0, 0, 1, 1], [], []>} : vector<4x128xf32>, vector<128x256xf32>, vector<4x256xf32> -> vector<4x256xf32>
    %35 = vector.broadcast %5 : vector<1x256xf32> to vector<4x256xf32>
    %36 = arith.addf %34, %35 : vector<4x256xf32>
    %37 = math.tanh %36 : vector<4x256xf32>
    %38 = vector.extract_strided_slice %37 {offsets = [0, 0], sizes = [2, 128], strides = [1, 1]} : vector<4x256xf32> to vector<2x128xf32>
    %39 = vector.extract_strided_slice %37 {offsets = [2, 128], sizes = [2, 128], strides = [1, 1]} : vector<4x256xf32> to vector<2x128xf32>
    %40 = vector.extract_strided_slice %7 {offsets = [0, 0], sizes = [1, 128], strides = [1, 1]} : vector<1x256xf32> to vector<1x128xf32>
    %41 = vector.broadcast %40 : vector<1x128xf32> to vector<2x128xf32>
    %42 = arith.mulf %38, %41 : vector<2x128xf32>
    %cst_17 = arith.constant dense<0.000000e+00> : vector<2xf32>
    %43 = vector.multi_reduction <add>, %42, %cst_17 [1] : vector<2x128xf32> to vector<2xf32>
    %44 = vector.shape_cast %43 : vector<2xf32> to vector<2x1xf32>
    %45 = vector.extract_strided_slice %6 {offsets = [0, 0], sizes = [1, 1], strides = [1, 1]} : vector<1x256xf32> to vector<1x1xf32>
    %46 = vector.broadcast %45 : vector<1x1xf32> to vector<2x1xf32>
    %47 = arith.addf %44, %46 : vector<2x1xf32>
    %48 = vector.extract_strided_slice %7 {offsets = [0, 128], sizes = [1, 128], strides = [1, 1]} : vector<1x256xf32> to vector<1x128xf32>
    %49 = vector.broadcast %48 : vector<1x128xf32> to vector<2x128xf32>
    %50 = arith.mulf %39, %49 : vector<2x128xf32>
    %cst_18 = arith.constant dense<0.000000e+00> : vector<2xf32>
    %51 = vector.multi_reduction <add>, %50, %cst_18 [1] : vector<2x128xf32> to vector<2xf32>
    %52 = vector.shape_cast %51 : vector<2xf32> to vector<2x1xf32>
    %53 = vector.extract_strided_slice %6 {offsets = [0, 128], sizes = [1, 1], strides = [1, 1]} : vector<1x256xf32> to vector<1x1xf32>
    %54 = vector.broadcast %53 : vector<1x1xf32> to vector<2x1xf32>
    %55 = arith.addf %52, %54 : vector<2x1xf32>
    %56 = vector.shape_cast %47 : vector<2x1xf32> to vector<2x1xf32>
    %57 = vector.broadcast %56 : vector<2x1xf32> to vector<2x128xf32>
    %58 = vector.shape_cast %55 : vector<2x1xf32> to vector<2x1xf32>
    %59 = vector.broadcast %58 : vector<2x1xf32> to vector<2x128xf32>
    %cst_19 = arith.constant 0.000000e+00 : f32
    %60 = vector.broadcast %cst_19 : f32 to vector<4x128xf32>
    %61 = tpu.concatenate %38, %57, %60 in 0 : vector<2x128xf32>, vector<2x128xf32>, vector<4x128xf32> -> vector<8x128xf32>
    %c0_20 = arith.constant 0 : index
    %c0_21 = arith.constant 0 : index
    %c0_22 = arith.constant 0 : index
    %62 = vector.load %arg4[%c0_20, %c0_21, %c0_22] : memref<2x8x128xf32, #tpu.memory_space<vmem>>, vector<1x8x128xf32>
    %63 = vector.shape_cast %62 : vector<1x8x128xf32> to vector<8x128xf32>
    %64 = vector.shape_cast %61 : vector<8x128xf32> to vector<1x8x128xf32>
    tpu.vector_store %arg4[%c0_20, %c0_21, %c0_22], %64 {strides = array<i32>} : memref<2x8x128xf32, #tpu.memory_space<vmem>>, vector<1x8x128xf32>,
    %65 = tpu.concatenate %39, %59, %60 in 0 : vector<2x128xf32>, vector<2x128xf32>, vector<4x128xf32> -> vector<8x128xf32>
    %c1 = arith.constant 1 : index
    %c0_23 = arith.constant 0 : index
    %c0_24 = arith.constant 0 : index
    %66 = vector.load %arg4[%c1, %c0_23, %c0_24] : memref<2x8x128xf32, #tpu.memory_space<vmem>>, vector<1x8x128xf32>
    %67 = vector.shape_cast %66 : vector<1x8x128xf32> to vector<8x128xf32>
    %68 = vector.shape_cast %65 : vector<8x128xf32> to vector<1x8x128xf32>
    tpu.vector_store %arg4[%c1, %c0_23, %c0_24], %68 {strides = array<i32>} : memref<2x8x128xf32, #tpu.memory_space<vmem>>, vector<1x8x128xf32>,
    return
  }
}

</mosaic_0001>

<bundles_post_ra>
// kernel: fused_qk_forward.1
= control target key start
LH: loop header
LB: loop body
LE: loop exit
PB: predicated region body
PF: predicated region fallthrough
CT: control target
= control target key end

     0   :  { %9 = vsyncpa [#allocation3], 0  ;;  %s694_s0 = inlined_call_operand.hbm [shape: f32[16,128], index: 0, kind: input, shape index: {}]   ;;  %s695_s1 = inlined_call_operand.hbm [shape: f32[128,256], index: 1, kind: input, shape index: {}]   ;;  %s696_s2 = inlined_call_operand.hbm [shape: f32[128,256], index: 2, kind: input, shape index: {}]   ;;  %s697_s3 = inlined_call_operand.hbm [shape: f32[8,256], index: 3, kind: input, shape index: {}]   ;;  %s698_s4 = inlined_call_operand.vmem [shape: f32[2,8,128], index: 4, kind: output, shape index: {}]  }
   0x1   :  { %10 = vsyncpa [#allocation5], 0 }
   0x2   :  { %11 = vsyncpa [#allocation8], 0  ;;  %s574_s15 = smov [#allocation4]   ;;  %s480_s19 = scalar_lea.hbm %s695_s1, 4096 }
   0x3   :  { %s29_s16 = sshll.u32 %s574_s15, 4  ;;  %p481_p0 = scmp.ne.s32.totalorder %s695_s1, %s480_s19  ;;  %s30_s16 = int_to_ptr.vmem [resolvable:$true] %s29_s16 }
   0x4   :  { %p484_p1 = scmp.lt.u32.totalorder %s480_s19, %s695_s1 }
   0x6   :  { %p486_p2 = pnand %p484_p1, %p481_p0 }
   0x8   :  { %489 = shalt.err (!%p486_p2)
}
   0x9   :  { %s490_s24 = scalar_lea.vmem %s30_s16, 4096  ;;  %p495_p4 = scmp.lt.s32.totalorder %s30_s16, %s30_s16 }
   0xa   :  { %p491_p3 = scmp.ne.s32.totalorder %s30_s16, %s490_s24  ;;  %p496_p5 = scmp.lt.s32.totalorder %s490_s24, %s490_s24 }
   0xc   :  { %p497_p6 = por %p496_p5, %p495_p4 }
   0xe   :  { %p498_p7 = pnand %p497_p6, %p491_p3 }
  0x10   :  { %501 = shalt.err (!%p498_p7)
}
  0x11   :  { %s575_s25 = smov 256   ;;  %s576_s26 = smov 16  }
  0x12   :  { %35 = dma.hbm_to_vmem [thread:$0]  %s695_s1, 4096, %s30_s16, [#allocation5], %s575_s25, %s575_s25, %s576_s26  }
  0x13   :  { %s577_s29 = smov [#allocation2]   ;;  %s502_s7 = scalar_lea.hbm %s694_s0, 256 }
  0x14   :  { %s17_s30 = sshll.u32 %s577_s29, 4  ;;  %p503_p8 = scmp.ne.s32.totalorder %s694_s0, %s502_s7  ;;  %s18_s30 = int_to_ptr.vmem [resolvable:$true] %s17_s30 }
  0x15   :  { %p506_p9 = scmp.lt.u32.totalorder %s502_s7, %s694_s0 }
  0x17   :  { %p508_p10 = pnand %p506_p9, %p503_p8 }
  0x19   :  { %511 = shalt.err (!%p508_p10)
}
  0x1a   :  { %s512_s12 = scalar_lea.vmem %s18_s30, 256  ;;  %p517_p12 = scmp.lt.s32.totalorder %s18_s30, %s18_s30 }
  0x1b   :  { %p513_p11 = scmp.ne.s32.totalorder %s18_s30, %s512_s12  ;;  %p518_p13 = scmp.lt.s32.totalorder %s512_s12, %s512_s12 }
  0x1d   :  { %p519_p0 = por %p518_p13, %p517_p12 }
  0x1f   :  { %p520_p1 = pnand %p519_p0, %p513_p11 }
  0x21   :  { %523 = shalt.err (!%p520_p1)
}
  0x22   :  { %s578_s1 = smov 128   ;;  %s579_s13 = smov 8  }
  0x23   :  { %23 = dma.hbm_to_vmem [thread:$0]  %s694_s0, 256, %s18_s30, [#allocation3], %s578_s1, %s578_s1, %s579_s13  }
  0x24   :  { %s580_s16 = smov [#allocation6]   ;;  %s581_s18 = smov [#allocation7]  }
  0x25   :  { %s41_s17 = sshll.u32 %s580_s16, 4  ;;  %s54_s19 = sshll.u32 %s581_s18, 4  ;;  %s42_s17 = int_to_ptr.vmem [resolvable:$true] %s41_s17  ;;  %s55_s19 = int_to_ptr.vmem [resolvable:$true] %s54_s19 }
  0x26   :  { %s524_s22 = scalar_lea.hbm %s696_s2, 4096 }
  0x27   :  { %p525_p2 = scmp.ne.s32.totalorder %s696_s2, %s524_s22  ;;  %p528_p3 = scmp.lt.u32.totalorder %s524_s22, %s696_s2 }
  0x29   :  { %p530_p4 = pnand %p528_p3, %p525_p2 }
  0x2b   :  { %533 = shalt.err (!%p530_p4)
}
  0x2c   :  { %s534_s0 = scalar_lea.vmem %s42_s17, 4096  ;;  %p539_p6 = scmp.lt.s32.totalorder %s42_s17, %s42_s17 }
  0x2d   :  { %p535_p5 = scmp.ne.s32.totalorder %s42_s17, %s534_s0  ;;  %p540_p7 = scmp.lt.s32.totalorder %s534_s0, %s534_s0 }
  0x2f   :  { %p541_p8 = por %p540_p7, %p539_p6 }
  0x31   :  { %p542_p9 = pnand %p541_p8, %p535_p5 }
  0x33   :  { %545 = shalt.err (!%p542_p9)
}
  0x34   :  { %47 = dma.hbm_to_vmem [thread:$0]  %s696_s2, 4096, %s42_s17, [#allocation5], %s575_s25, %s575_s25, %s576_s26  }
  0x35   :  { %s546_s7 = scalar_lea.hbm %s697_s3, 256 }
  0x36   :  { %p547_p10 = scmp.ne.s32.totalorder %s697_s3, %s546_s7  ;;  %p550_p11 = scmp.lt.u32.totalorder %s546_s7, %s697_s3 }
  0x38   :  { %p552_p12 = pnand %p550_p11, %p547_p10 }
  0x3a   :  { %555 = shalt.err (!%p552_p12)
}
  0x3b   :  { %s556_s12 = scalar_lea.vmem %s55_s19, 256  ;;  %p561_p0 = scmp.lt.s32.totalorder %s55_s19, %s55_s19 }
  0x3c   :  { %p557_p13 = scmp.ne.s32.totalorder %s55_s19, %s556_s12  ;;  %p562_p1 = scmp.lt.s32.totalorder %s556_s12, %s556_s12 }
  0x3e   :  { %p563_p2 = por %p562_p1, %p561_p0 }
  0x40   :  { %p564_p3 = pnand %p563_p2, %p557_p13 }
  0x42   :  { %567 = shalt.err (!%p564_p3)
}
  0x43   :  { %57 = dma.hbm_to_vmem [thread:$0]  %s697_s3, 256, %s55_s19, [#allocation8]  }
  0x44   :  { %568 = dma.done.wait [#allocation3], 256  }
  0x45   :  { %569 = vsyncadd [#allocation3], 4294967040 }
  0x46   :  { %570 = dma.done.wait [#allocation5], 8192  }
  0x47   :  { %571 = vsyncadd [#allocation5], 4294959104 }
  0x48   :  { %572 = dma.done.wait [#allocation8], 256  }
  0x49   :  { %573 = vsyncadd [#allocation8], 4294967040  ;;  %v582_v0 = vmov 0.0   ;;  %v73_v1 = vld [vmem:[#allocation4 + $0x8] sm:$0xff]  ;;  %v75_v2 = vld [vmem:[#allocation4 + $0x18] sm:$0xff]  ;;  %vm256_vm0 = vcmask 1040384  }
  0x4a   :  { %210 = vmatprep.mubr.f32.mxu0 %v582_v0  ;;  %334 = vmatprep.mubr.f32.mxu1 %v582_v0  ;;  %v72_v3 = vld [vmem:[#allocation4] sm:$0xff]  ;;  %v400_v4 = vpack.c.bf16 %v75_v2, %v73_v1  ;;  %v74_v5 = vld [vmem:[#allocation4 + $0x10] sm:$0xff]  ;;  %v77_v6 = vld [vmem:[#allocation4 + $0x28] sm:$0xff]  ;;  %vm258_vm1 = vcmask 1041408   ;;  %vm260_vm2 = vcmask 1042432   ;;  %vm361_vm3 = vcmask 1043458  }
  0x4b   :  { %v79_v7 = vld [vmem:[#allocation4 + $0x38] sm:$0xff]  ;;  %v402_v8 = vpack.c.bf16 %v74_v5, %v72_v3  ;;  %v76_v10 = vld [vmem:[#allocation4 + $0x20] sm:$0xff]  ;;  %v78_v11 = vld [vmem:[#allocation4 + $0x30] sm:$0xff]  ;;  %vm382_vm4 = vcmask 1043456  }
  0x4c   :  { %v404_v9 = vpack.c.bf16 %v79_v7, %v77_v6  ;;  %v81_v12 = vld [vmem:[#allocation4 + $0x48] sm:$0xff]  ;;  %401 = vmatprep.subr.bf16.mxu0 %v400_v4  ;;  %v83_v13 = vld [vmem:[#allocation4 + $0x58] sm:$0xff]  ;;  %v406_v14 = vpack.c.bf16 %v78_v11, %v76_v10  ;;  %v80_v16 = vld [vmem:[#allocation4 + $0x40] sm:$0xff] }
  0x4d   :  { %403 = vmatpush1.bf16.msra.mxu0 %v402_v8  ;;  %v408_v15 = vpack.c.bf16 %v83_v13, %v81_v12  ;;  %v82_v17 = vld [vmem:[#allocation4 + $0x50] sm:$0xff]  ;;  %v85_v18 = vld [vmem:[#allocation4 + $0x68] sm:$0xff]  ;;  %v87_v19 = vld [vmem:[#allocation4 + $0x78] sm:$0xff] }
  0x4e   :  { %405 = vmatprep.subr.bf16.mxu0 %v404_v9  ;;  %v410_v20 = vpack.c.bf16 %v82_v17, %v80_v16  ;;  %v412_v21 = vpack.c.bf16 %v87_v19, %v85_v18  ;;  %v84_v22 = vld [vmem:[#allocation4 + $0x60] sm:$0xff]  ;;  %v86_v23 = vld [vmem:[#allocation4 + $0x70] sm:$0xff]  ;;  %v89_v24 = vld [vmem:[#allocation4 + $0x88] sm:$0xff] }
  0x4f   :  { %v91_v25 = vld [vmem:[#allocation4 + $0x98] sm:$0xff]  ;;  %v88_v26 = vld [vmem:[#allocation4 + $0x80] sm:$0xff]  ;;  %v90_v27 = vld [vmem:[#allocation4 + $0x90] sm:$0xff]  ;;  %v414_v30 = vpack.c.bf16 %v86_v23, %v84_v22 }
  0x50   :  { %v105_v28 = vld [vmem:[#allocation6 + $0x8] sm:$0xff]  ;;  %v107_v29 = vld [vmem:[#allocation6 + $0x18] sm:$0xff]  ;;  %v104_v32 = vld [vmem:[#allocation6] sm:$0xff]  ;;  %v416_v35 = vpack.c.bf16 %v91_v25, %v89_v24  ;;  %v418_v44 = vpack.c.bf16 %v90_v27, %v88_v26 }
  0x51   :  { %407 = vmatpush1.bf16.msra.mxu0 %v406_v14  ;;  %v432_v31 = vpack.c.bf16 %v107_v29, %v105_v28  ;;  %v106_v33 = vld [vmem:[#allocation6 + $0x10] sm:$0xff]  ;;  %v109_v34 = vld [vmem:[#allocation6 + $0x28] sm:$0xff]  ;;  %v111_v37 = vld [vmem:[#allocation6 + $0x38] sm:$0xff] }
  0x52   :  { %409 = vmatprep.subr.bf16.mxu0 %v408_v15  ;;  %v434_v36 = vpack.c.bf16 %v106_v33, %v104_v32  ;;  %v108_v38 = vld [vmem:[#allocation6 + $0x20] sm:$0xff]  ;;  %v110_v39 = vld [vmem:[#allocation6 + $0x30] sm:$0xff]  ;;  %v93_v40 = vld [vmem:[#allocation4 + $0xa8] sm:$0xff]  ;;  %v436_v42 = vpack.c.bf16 %v111_v37, %v109_v34 }
  0x53   :  { %v95_v41 = vld [vmem:[#allocation4 + $0xb8] sm:$0xff]  ;;  %433 = vmatprep.subr.bf16.mxu1 %v432_v31  ;;  %v438_v43 = vpack.c.bf16 %v110_v39, %v108_v38  ;;  %v92_v46 = vld [vmem:[#allocation4 + $0xa0] sm:$0xff]  ;;  %v94_v47 = vld [vmem:[#allocation4 + $0xb0] sm:$0xff] }
  0x54   :  { %435 = vmatpush1.bf16.msra.mxu1 %v434_v36  ;;  %v420_v45 = vpack.c.bf16 %v95_v41, %v93_v40  ;;  %v97_v48 = vld [vmem:[#allocation4 + $0xc8] sm:$0xff]  ;;  %v99_v49 = vld [vmem:[#allocation4 + $0xd8] sm:$0xff]  ;;  %v422_v50 = vpack.c.bf16 %v94_v47, %v92_v46  ;;  %v96_v52 = vld [vmem:[#allocation4 + $0xc0] sm:$0xff] }
  0x55   :  { %411 = vmatpush1.bf16.msra.mxu0 %v410_v20  ;;  %437 = vmatprep.subr.bf16.mxu1 %v436_v42  ;;  %v424_v51 = vpack.c.bf16 %v99_v49, %v97_v48  ;;  %v98_v53 = vld [vmem:[#allocation4 + $0xd0] sm:$0xff]  ;;  %v101_v54 = vld [vmem:[#allocation4 + $0xe8] sm:$0xff]  ;;  %v103_v55 = vld [vmem:[#allocation4 + $0xf8] sm:$0xff] }
  0x56   :  { %413 = vmatprep.subr.bf16.mxu0 %v412_v21  ;;  %v426_v56 = vpack.c.bf16 %v98_v53, %v96_v52  ;;  %v428_v57 = vpack.c.bf16 %v103_v55, %v101_v54  ;;  %v100_v58 = vld [vmem:[#allocation4 + $0xe0] sm:$0xff]  ;;  %v102_v59 = vld [vmem:[#allocation4 + $0xf0] sm:$0xff]  ;;  %v71_v62 = vld [vmem:[#allocation2 + $0x8] sm:$0xff] }
  0x57   :  { %v430_v60 = vpack.c.bf16 %v102_v59, %v100_v58  ;;  %v70_v61 = vld [vmem:[#allocation2] sm:$0xff]  ;;  %v113_v63 = vld [vmem:[#allocation6 + $0x48] sm:$0xff]  ;;  %v115_v1 = vld [vmem:[#allocation6 + $0x58] sm:$0xff] }
  0x58   :  { %439 = vmatpush1.bf16.msra.mxu1 %v438_v43  ;;  %v440_v2 = vpack.c.bf16 %v115_v1, %v113_v63  ;;  %v112_v3 = vld [vmem:[#allocation6 + $0x40] sm:$0xff]  ;;  %v114_v4 = vld [vmem:[#allocation6 + $0x50] sm:$0xff]  ;;  %v117_v6 = vld [vmem:[#allocation6 + $0x68] sm:$0xff] }
  0x59   :  { %415 = vmatpush1.bf16.msra.mxu0 %v414_v30  ;;  %v442_v5 = vpack.c.bf16 %v114_v4, %v112_v3  ;;  %v119_v7 = vld [vmem:[#allocation6 + $0x78] sm:$0xff]  ;;  %v116_v9 = vld [vmem:[#allocation6 + $0x60] sm:$0xff]  ;;  %v118_v10 = vld [vmem:[#allocation6 + $0x70] sm:$0xff] }
  0x5a   :  { %417 = vmatprep.subr.bf16.mxu0 %v416_v35  ;;  %441 = vmatprep.subr.bf16.mxu1 %v440_v2  ;;  %v444_v8 = vpack.c.bf16 %v119_v7, %v117_v6  ;;  %v446_v11 = vpack.c.bf16 %v118_v10, %v116_v9  ;;  %v121_v12 = vld [vmem:[#allocation6 + $0x88] sm:$0xff]  ;;  %v120_v14 = vld [vmem:[#allocation6 + $0x80] sm:$0xff]  ;;  %v122_v15 = vld [vmem:[#allocation6 + $0x90] sm:$0xff]  ;;  %v138_v35 = vlaneseq }
  0x5b   :  { %v450_v16 = vpack.c.bf16 %v122_v15, %v120_v14  ;;  %v125_v17 = vld [vmem:[#allocation6 + $0xa8] sm:$0xff]  ;;  %v127_v18 = vld [vmem:[#allocation6 + $0xb8] sm:$0xff]  ;;  %v124_v20 = vld [vmem:[#allocation6 + $0xa0] sm:$0xff] }
  0x5c   :  { %443 = vmatpush1.bf16.msra.mxu1 %v442_v5  ;;  %v452_v19 = vpack.c.bf16 %v127_v18, %v125_v17  ;;  %v126_v21 = vld [vmem:[#allocation6 + $0xb0] sm:$0xff]  ;;  %v129_v23 = vld [vmem:[#allocation6 + $0xc8] sm:$0xff]  ;;  %v131_v24 = vld [vmem:[#allocation6 + $0xd8] sm:$0xff]  ;;  %v666_v36 = vshrl.u32 %v138_v35, 7 }
  0x5d   :  { %419 = vmatpush1.bf16.msra.mxu0 %v418_v44  ;;  %445 = vmatprep.subr.bf16.mxu1 %v444_v8  ;;  %v454_v22 = vpack.c.bf16 %v126_v21, %v124_v20  ;;  %v456_v25 = vpack.c.bf16 %v131_v24, %v129_v23  ;;  %v128_v26 = vld [vmem:[#allocation6 + $0xc0] sm:$0xff]  ;;  %v130_v27 = vld [vmem:[#allocation6 + $0xd0] sm:$0xff]  ;;  %v133_v29 = vld [vmem:[#allocation6 + $0xe8] sm:$0xff] }
  0x5e   :  { %421 = vmatprep.subr.bf16.mxu0 %v420_v45  ;;  %v458_v28 = vpack.c.bf16 %v130_v27, %v128_v26  ;;  %v135_v30 = vld [vmem:[#allocation6 + $0xf8] sm:$0xff]  ;;  %v132_v32 = vld [vmem:[#allocation6 + $0xe0] sm:$0xff]  ;;  %v134_v33 = vld [vmem:[#allocation6 + $0xf0] sm:$0xff]  ;;  %v140_v37 = vsub.s32 0, %v666_v36  ;;  %v264_v21 = vsub.s32 1, %v666_v36 }
  0x5f   :  { %v460_v31 = vpack.c.bf16 %v135_v30, %v133_v29  ;;  %v462_v34 = vpack.c.bf16 %v134_v33, %v132_v32  ;;  %v669_v38 = vld [vmem:[#allocation7] sm:$0xff]  ;;  %v671_v39 = vld [vmem:[#allocation7 + $0x8] sm:$0xff] }
  0x60   :  { %447 = vmatpush1.bf16.msra.mxu1 %v446_v11  ;;  %v141_v40 = vrot.slane %v669_v38, %v140_v37  ;;  %v145_v41 = vrot.slane %v671_v39, %v140_v37  ;;  %v269_v23 = vrot.slane %v671_v39, %v264_v21 }
  0x61   :  { %423 = vmatpush1.bf16.msra.mxu0 %v422_v50 }
  0x62   :  { %425 = vmatprep.subr.bf16.mxu0 %v424_v51 }
  0x65   :  { %427 = vmatpush1.bf16.msra.mxu0 %v426_v56 }
  0x66   :  { %429 = vmatprep.subr.bf16.mxu0 %v428_v57 }
  0x69   :  { %431 = vmatpush1.bf16.msra.mxu0 %v430_v60 }
  0x6c   :  { %211 = vmatmul.mubr.f32.vlgmr.msra.gmra.mrb[0].mxu0 %v70_v61 }
  0x6d   :  { %216 = vmatprep.mubr.f32.mxu0 %v582_v0  ;;  %v123_v0 = vld [vmem:[#allocation6 + $0x98] sm:$0xff] }
  0x6e   :  { %v448_v13 = vpack.c.bf16 %v123_v0, %v121_v12 }
  0x70   :  { %217 = vmatmul.mubr.f32.gmra.mrb[2].mxu0 %v71_v62  ;;  %449 = vmatprep.subr.bf16.mxu1 %v448_v13 }
  0x71   :  { %451 = vmatpush1.bf16.msra.mxu1 %v450_v16 }
  0x72   :  { %453 = vmatprep.subr.bf16.mxu1 %v452_v19 }
  0x75   :  { %455 = vmatpush1.bf16.msra.mxu1 %v454_v22  ;;  %v265_v22 = vrot.slane %v669_v38, %v264_v21 }
  0x76   :  { %457 = vmatprep.subr.bf16.mxu1 %v456_v25 }
  0x79   :  { %459 = vmatpush1.bf16.msra.mxu1 %v458_v28  ;;  %v345_v28 = vsub.s32 3, %v666_v36 }
  0x7a   :  { %461 = vmatprep.subr.bf16.mxu1 %v460_v31 }
  0x7b   :  { %v346_v29 = vrot.slane %v669_v38, %v345_v28  ;;  %v359_v30 = vrot.slane %v671_v39, %v345_v28 }
  0x7d   :  { %463 = vmatpush1.bf16.msra.mxu1 %v462_v34 }
 0x13f   :  { %v212_v42 = vpop.f32.mrb[0].mxu0 }
 0x140   :  { %v213_v43 = vadd.f32 %v212_v42, %v141_v40  ;;  %v214_v44 = vpop.f32.mrb[1].mxu0 }
 0x141   :  { %v215_v45 = vadd.f32 %v214_v44, %v145_v41 }
 0x142   :  { %v223_v46 = vmax.f32 %v213_v43, 0.0 }
 0x143   :  { %v224_v47 = vmax.f32 %v215_v45, 0.0  ;;  %v218_v48 = vpop.f32.mrb[2].mxu0 }
 0x144   :  { %v227_v49 = vrot.slane %v223_v46, 4  ;;  %v219_v50 = vadd.f32 %v218_v48, %v141_v40  ;;  %v220_v51 = vpop.f32.mrb[3].mxu0  ;;  %v583_v40 = vmov 0  }
 0x145   :  { %v242_v52 = vrot.slane %v224_v47, 4  ;;  %v221_v53 = vadd.f32 %v220_v51, %v145_v41  ;;  %474 = vset.pattern.permute.xlu1 %v583_v40  ;;  %475 = vset.pattern.permute.xlu0 %v583_v40  ;;  %v353_v41 = vsub.s32 2, %v666_v36 }
 0x146   :  { %v228_v54 = vadd.f32 %v227_v49, %v223_v46  ;;  %v225_v55 = vmax.f32 %v219_v50, 0.0 }
 0x147   :  { %v243_v56 = vadd.f32 %v242_v52, %v224_v47  ;;  %v226_v57 = vmax.f32 %v221_v53, 0.0  ;;  %v354_v42 = vrot.slane %v669_v38, %v353_v41  ;;  %v368_v45 = vrot.slane %v671_v39, %v353_v41 }
 0x148   :  { %v229_v58 = vrot.slane %v228_v54, 2  ;;  %v235_v59 = vrot.slane %v225_v55, 4 }
 0x149   :  { %v244_v60 = vrot.slane %v243_v56, 2  ;;  %v249_v61 = vrot.slane %v226_v57, 4 }
 0x14a   :  { %v230_v62 = vadd.f32 %v229_v58, %v228_v54  ;;  %v236_v63 = vadd.f32 %v235_v59, %v225_v55 }
 0x14b   :  { %v245_v1 = vadd.f32 %v244_v60, %v243_v56  ;;  %v250_v2 = vadd.f32 %v249_v61, %v226_v57 }
 0x14c   :  { %v231_v3 = vrot.slane %v230_v62, 1  ;;  %v237_v4 = vrot.slane %v236_v63, 2 }
 0x14d   :  { %v246_v5 = vrot.slane %v245_v1, 1  ;;  %v251_v6 = vrot.slane %v250_v2, 2 }
 0x14e   :  { %v238_v7 = vadd.f32 %v237_v4, %v236_v63  ;;  %v232_v9 = vadd.f32 %v231_v3, %v230_v62 }
 0x14f   :  { %v252_v8 = vadd.f32 %v251_v6, %v250_v2  ;;  %v247_v11 = vadd.f32 %v246_v5, %v245_v1 }
 0x150   :  { %v239_v10 = vrot.slane %v238_v7, 1  ;;  %v234_v14 = vmul.f32 0.125, %v232_v9 }
 0x151   :  { %v253_v12 = vrot.slane %v252_v8, 1  ;;  %v248_v16 = vmul.f32 0.125, %v247_v11 }
 0x152   :  { %v240_v0 = vadd.f32 %v239_v10, %v238_v7 }
 0x153   :  { %v254_v13 = vadd.f32 %v253_v12, %v252_v8 }
 0x154   :  { %v241_v15 = vmul.f32 0.125, %v240_v0 }
 0x155   :  { %v255_v17 = vmul.f32 0.125, %v254_v13 }
 0x156   :  { %v257_v18 = vsel %vm256_vm0, %v234_v14, %v241_v15 }
 0x157   :  { %v259_v19 = vsel %vm258_vm1, %v257_v18, %v248_v16 }
 0x158   :  { %v261_v20 = vsel %vm260_vm2, %v259_v19, %v255_v17 }
 0x159   :  { %335 = vmatmul.mubr.f32.vlgmr.msra.gmra.mrb[0].mxu1 %v261_v20 }
 0x22c   :  { %v336_v24 = vpop.f32.mrb[0].mxu1 }
 0x22d   :  { %v337_v25 = vadd.f32 %v336_v24, %v265_v22  ;;  %v338_v26 = vpop.f32.mrb[1].mxu1 }
 0x22e   :  { %v339_v27 = vadd.f32 %v338_v26, %v269_v23 }
 0x22f   :  { %476 = vtanh.f32 %v337_v25 }
 0x230   :  { %478 = vtanh.f32 %v339_v27 }
 0x239   :  { %v477_v31 = vpop.eup %476 }
 0x23a   :  { %v479_v32 = vpop.eup %478  ;;  %v347_v33 = vmul.f32 %v477_v31, %v346_v29 }
 0x23b   :  { %v360_v35 = vmul.f32 %v479_v32, %v359_v30  ;;  %v386_v51 = vrot.slane %v479_v32, 2 }
 0x23c   :  { %v348_v34 = vsel %vm258_vm1, %v347_v33, 0.0 }
 0x23d   :  { %349 = vadd.xlane.f32.xlu0 %v348_v34  ;;  %v362_v37 = vsel %vm361_vm3, %v360_v35, 0.0 }
 0x241   :  { %363 = vadd.xlane.f32.xlu0 %v362_v37 }
 0x2ca   :  { %v350_v43 = vpop.xlane.xlu0 %349 }
 0x2cb   :  { %v355_v44 = vadd.f32 %v354_v42, %v350_v43 }
 0x2cd   :  { %372 = vperm.xlu1 %474, %v355_v44  }
 0x2ce   :  { %v364_v46 = vpop.xlane.xlu0 %363 }
 0x2cf   :  { %v369_v47 = vadd.f32 %v368_v45, %v364_v46 }
 0x2d1   :  { %376 = vperm.xlu1 %474, %v369_v47  }
 0x34c   :  { %v373_v48 = vpop.permute.xlu1 %372 }
 0x34d   :  { %v379_v49 = vrot.slane %v373_v48, 6 }
 0x34f   :  { %v381_v50 = vsel %vm258_vm1, %v477_v31, %v379_v49 }
 0x350   :  { %v383_v52 = vsel %vm382_vm4, %v381_v50, 0.0  ;;  %v377_v53 = vpop.permute.xlu1 %376 }
 0x351   :  { %384 = vst [vmem:[%s698_s4] sm:$0xff] %v383_v52  ;;  %v388_v36 = vsel %vm258_vm1, %v386_v51, %v377_v53 }
 0x352   :  { %v389_v38 = vsel %vm382_vm4, %v388_v36, 0.0 }
 0x353   :  { %399 = vst [vmem:[%s698_s4 + $0x8] sm:$0xff] %v389_v38 }
 0x354   :  { %396 = vsyncpa [#allocation3], 1 }
 0x355   :  { %397 = vsyncpa [#allocation5], 1 }
 0x356   :  { %398 = vsyncpa [#allocation8], 1 }

</bundles_post_ra>
